<compile_context>
chip_gen: v7x
topology: tpu7x:2x2x1
jax: 0.10.0
libtpu: 0.0.40
codegen_flags: <defaults>
</compile_context>

<pallas_src>
import functools

import numpy as np
import jax
import jax.numpy as jnp
from jax import lax
from jax.experimental import pallas as pl
from jax.experimental.pallas import tpu as pltpu

BLOCK_SIZE = 4
BLOCKS_A0 = 32 // BLOCK_SIZE                   # 8
BLOCKS_A1 = 32 // BLOCK_SIZE                   # 8
CH = 3
H = W = 32
FEAT = BLOCK_SIZE * BLOCK_SIZE * CH            # 48
ROWS = CH * BLOCKS_A0                          # 24  (sublanes: 8*c + block_row)
LANES = BLOCK_SIZE * W                         # 128 (lanes: 32*i + 4*block_col + j)

MEAN = np.array([0.4914, 0.4822, 0.4465], dtype=np.float32)
STD = np.array([0.2471, 0.2435, 0.2616], dtype=np.float32)

# Batch tile: (in + out) * 2 buffers * TB * 12 KiB ~= 6 MiB at TB=128 ->
# comfortably inside v7x's 32 MiB scoped / 64 MiB physical VMEM.
TB_MAX = 128


# ---------------------------------------------------------------------------
# Roll-direction calibration (one tiny kernel, cached): guarantees the shift
# sign we bake into the plan matches this JAX version's pltpu.roll semantics.
# ---------------------------------------------------------------------------
@functools.lru_cache(maxsize=None)
def _roll_moves_forward():
    # True  -> pltpu.roll(x, s, axis) moves element k to lane (k + s) % n
    def k(x_ref, o_ref):
        o_ref[...] = pltpu.roll(x_ref[...], 1, axis=1)

    x = jnp.broadcast_to(lax.iota(jnp.float32, LANES)[None, :], (8, LANES))
    y = pl.pallas_call(
        k, out_shape=jax.ShapeDtypeStruct((8, LANES), jnp.float32))(x)
    return bool(jnp.asarray(y)[0, 1] == 0.0)


# ---------------------------------------------------------------------------
# Static shuffle plan: for every output feature (c', i', j') find its source
# feature under the key and express the move as (src channel, lane shift,
# destination lane mask).  Built once per (key, decrypt) in plain Python.
# ---------------------------------------------------------------------------
def _feat_to_cij(f):
    # segment() flattens [i, j, c] -> f = 12*i + 3*j + c
    i, r = divmod(int(f), 12)
    j, c = divmod(r, 3)
    return c, i, j


def _build_plan(key, decrypt):
    key = np.asarray(key)
    if key.dtype == np.bool_:
        raise ValueError(
            "binary keys (generate_key(..., binary=True)) cannot drive the "
            "block shuffle; pass an integer permutation key")
    perm = np.argsort(key) if decrypt else key      # source feature per output
    plan = [[] for _ in range(CH)]                  # grouped by output channel
    for f_out in range(FEAT):
        c_o, i_o, j_o = _feat_to_cij(f_out)
        c_s, i_s, j_s = _feat_to_cij(perm[f_out])
        shift = ((32 * i_o + j_o) - (32 * i_s + j_s)) % LANES
        plan[c_o].append((c_s, shift, i_o, j_o))
    return plan


# ---------------------------------------------------------------------------
# Kernels (operate on (tb, 24, 128) tiles of the reshaped NCHW tensor)
# ---------------------------------------------------------------------------
def _make_shuffle_kernel(plan, scale=None, bias=None):
    """Fused segment -> key shuffle -> integrate (+ optional normalize)."""
    roll_fwd = _roll_moves_forward()

    def kernel(x_ref, o_ref):
        tb = x_ref.shape[0]
        lane = lax.broadcasted_iota(jnp.int32, (1, LANES), 1)
        dst_mask = {(i, j): (lane // 32 == i) & (lane % 4 == j)
                    for i in range(BLOCK_SIZE) for j in range(BLOCK_SIZE)}

        # Per-channel sublane slabs, optionally normalized on the fly.
        slabs = []
        for c in range(CH):
            s = x_ref[:, 8 * c:8 * c + 8, :].reshape(tb * 8, LANES)
            if scale is not None:
                s = s * scale[c] + bias[c]
            slabs.append(s)

        for c_o in range(CH):
            acc = None
            for (c_s, shift, i_o, j_o) in plan[c_o]:
                eff = shift if roll_fwd else (LANES - shift) % LANES
                rolled = slabs[c_s] if eff == 0 else pltpu.roll(
                    slabs[c_s], eff, axis=1)
                if acc is None:
                    acc = rolled            # its dst lanes survive later selects
                else:
                    acc = jnp.where(dst_mask[(i_o, j_o)], rolled, acc)
            o_ref[:, 8 * c_o:8 * c_o + 8, :] = acc.reshape(tb, 8, LANES)

    return kernel


def _make_affine_kernel(scale, bias):
    """Per-channel y = x * scale[c] + bias[c] with scalar immediates."""
    scale = [float(v) for v in np.asarray(scale)]
    bias = [float(v) for v in np.asarray(bias)]

    def kernel(x_ref, o_ref):
        for c in range(CH):
            o_ref[:, 8 * c:8 * c + 8, :] = (
                x_ref[:, 8 * c:8 * c + 8, :] * scale[c] + bias[c])

    return kernel


def _run_tiled(kernel, x, donate_input=False):
    """Batch-tiled pallas_call over the free (B, 24, 128) view of NCHW."""
    B = x.shape[0]
    xr = x.reshape(B, ROWS, LANES)          # contiguous reshape: no HBM copy
    tb = min(B, TB_MAX)
    kwargs = {}
    if donate_input:
        kwargs["input_output_aliases"] = {0: 0}
    out = pl.pallas_call(
        kernel,
        out_shape=jax.ShapeDtypeStruct((B, ROWS, LANES), x.dtype),
        grid=(pl.cdiv(B, tb),),
        in_specs=[pl.BlockSpec((tb, ROWS, LANES), lambda i: (i, 0, 0))],
        out_specs=pl.BlockSpec((tb, ROWS, LANES), lambda i: (i, 0, 0)),
        compiler_params=pltpu.CompilerParams(
            dimension_semantics=("parallel",)),
        **kwargs,
    )(xr)
    return out.reshape(B, CH, H, W)


# ---------------------------------------------------------------------------
# DataTransform API
# ---------------------------------------------------------------------------
def normalize(X):
    return _run_tiled(_make_affine_kernel(1.0 / STD, -MEAN / STD), X)


def denormalize(X):
    return _run_tiled(_make_affine_kernel(STD, MEAN), X)


def generate_key(seed, binary=False):
    # torch.randperm replaced by a numpy permutation (same semantics,
    # different RNG stream).
    key = np.random.RandomState(seed).permutation(FEAT)
    if binary:
        key = key > len(key) / 2
    return key


def forward(X, key, decrypt=False, normalize_input=False):
    # TODO(synk): the reference base-class forward() raises NotImplementedError;
    # this composes the module's building blocks (segment -> key shuffle ->
    # integrate), fully fused into one Pallas kernel.
    plan = _build_plan(key, decrypt)
    if normalize_input:
        scale = tuple(float(v) for v in (1.0 / STD))
        bias = tuple(float(v) for v in (-MEAN / STD))
    else:
        scale = bias = None
    return _run_tiled(_make_shuffle_kernel(plan, scale, bias), X)


# Pure-JAX segment()/integrate(): reference/glue only (NOT on the fast path;
# the fused kernel performs the same layout change in-register).
def segment(X):
    X = jnp.transpose(X, (0, 2, 3, 1))
    X = X.reshape(-1, BLOCKS_A0, BLOCK_SIZE, BLOCKS_A1, BLOCK_SIZE, CH)
    X = jnp.transpose(X, (0, 1, 3, 2, 4, 5))
    X = X.reshape(-1, BLOCKS_A0, BLOCKS_A1, FEAT)
    return X


def integrate(X):
    X = X.reshape(-1, BLOCKS_A0, BLOCKS_A1, BLOCK_SIZE, BLOCK_SIZE, CH)
    X = jnp.transpose(X, (0, 1, 3, 2, 4, 5))
    X = X.reshape(-1, BLOCKS_A0 * BLOCK_SIZE, BLOCKS_A1 * BLOCK_SIZE, CH)
    X = jnp.transpose(X, (0, 3, 1, 2))
    return X


# ---------------------------------------------------------------------------
if __name__ == "__main__":
    rng = jax.random.PRNGKey(0)
    B = 2
    X = jax.random.uniform(rng, (B, CH, H, W), dtype=jnp.float32)
    key = generate_key(seed=0)

    Xn = normalize(X)
    Xd = denormalize(Xn)
    Xe = forward(X, key, decrypt=False)
    Xr = forward(Xe, key, decrypt=True)
    Xne = forward(X, key, decrypt=False, normalize_input=True)
    jax.block_until_ready((Xn, Xd, Xe, Xr, Xne))

    # sanity checks against pure-JAX references
    mean_b = jnp.asarray(MEAN)[None, :, None, None]
    std_b = jnp.asarray(STD)[None, :, None, None]
    ref_n = (X - mean_b) / std_b
    assert jnp.allclose(Xn, ref_n, atol=1e-5), "normalize mismatch"
    assert jnp.allclose(Xd, X, atol=1e-5), "denormalize(normalize(x)) != x"

    ref_e = integrate(segment(X)[..., np.asarray(key)])
    assert jnp.allclose(Xe, ref_e, atol=1e-5), "block shuffle mismatch"
    assert jnp.allclose(Xr, X, atol=1e-5), "decrypt(encrypt(x)) != x"

    ref_ne = integrate(segment(ref_n)[..., np.asarray(key)])
    assert jnp.allclose(Xne, ref_ne, atol=1e-5), "fused normalize+shuffle mismatch"

    print("KERNEL_OK")
</pallas_src>

<mosaic_0001>
module attributes {stable_mosaic.version = 11 : i64} {
  func.func @kernel(%arg0: i32, %arg1: memref<2x24x128xf32, #tpu.memory_space<vmem>>, %arg2: memref<2x24x128xf32, #tpu.memory_space<vmem>>) attributes {dimension_semantics = [#tpu.dimension_semantics<parallel>], iteration_bounds = array<i64: 1>, scalar_prefetch = 0 : i64, scratch_operands = 0 : i64, tpu.core_type = #tpu.core_type<tc>, window_params = [{transform_indices = @transform_0, window_bounds = array<i64: 2, 24, 128>}, {transform_indices = @transform_1, window_bounds = array<i64: 2, 24, 128>}]} {
    %c0 = arith.constant 0 : index
    %c0_0 = arith.constant 0 : index
    %c0_1 = arith.constant 0 : index
    %0 = vector.load %arg1[%c0, %c0_0, %c0_1] : memref<2x24x128xf32, #tpu.memory_space<vmem>>, vector<2x8x128xf32>
    %cst = arith.constant 4.04694462 : f32
    %1 = vector.broadcast %cst : f32 to vector<2x8x128xf32>
    %2 = arith.mulf %0, %1 : vector<2x8x128xf32>
    %cst_2 = arith.constant -1.98866856 : f32
    %3 = vector.broadcast %cst_2 : f32 to vector<2x8x128xf32>
    %4 = arith.addf %2, %3 : vector<2x8x128xf32>
    %c0_3 = arith.constant 0 : index
    %c0_4 = arith.constant 0 : index
    %c0_5 = arith.constant 0 : index
    %5 = vector.load %arg2[%c0_3, %c0_4, %c0_5] : memref<2x24x128xf32, #tpu.memory_space<vmem>>, vector<2x8x128xf32>
    tpu.vector_store %arg2[%c0_3, %c0_4, %c0_5], %4 {strides = array<i32>} : memref<2x24x128xf32, #tpu.memory_space<vmem>>, vector<2x8x128xf32>,
    %c0_6 = arith.constant 0 : index
    %c8 = arith.constant 8 : index
    %c0_7 = arith.constant 0 : index
    %6 = vector.load %arg1[%c0_6, %c8, %c0_7] : memref<2x24x128xf32, #tpu.memory_space<vmem>>, vector<2x8x128xf32>
    %cst_8 = arith.constant 4.10677624 : f32
    %7 = vector.broadcast %cst_8 : f32 to vector<2x8x128xf32>
    %8 = arith.mulf %6, %7 : vector<2x8x128xf32>
    %cst_9 = arith.constant -1.98028755 : f32
    %9 = vector.broadcast %cst_9 : f32 to vector<2x8x128xf32>
    %10 = arith.addf %8, %9 : vector<2x8x128xf32>
    %c0_10 = arith.constant 0 : index
    %c8_11 = arith.constant 8 : index
    %c0_12 = arith.constant 0 : index
    %11 = vector.load %arg2[%c0_10, %c8_11, %c0_12] : memref<2x24x128xf32, #tpu.memory_space<vmem>>, vector<2x8x128xf32>
    tpu.vector_store %arg2[%c0_10, %c8_11, %c0_12], %10 {strides = array<i32>} : memref<2x24x128xf32, #tpu.memory_space<vmem>>, vector<2x8x128xf32>,
    %c0_13 = arith.constant 0 : index
    %c16 = arith.constant 16 : index
    %c0_14 = arith.constant 0 : index
    %12 = vector.load %arg1[%c0_13, %c16, %c0_14] : memref<2x24x128xf32, #tpu.memory_space<vmem>>, vector<2x8x128xf32>
    %cst_15 = arith.constant 3.82263017 : f32
    %13 = vector.broadcast %cst_15 : f32 to vector<2x8x128xf32>
    %14 = arith.mulf %12, %13 : vector<2x8x128xf32>
    %cst_16 = arith.constant -1.70680439 : f32
    %15 = vector.broadcast %cst_16 : f32 to vector<2x8x128xf32>
    %16 = arith.addf %14, %15 : vector<2x8x128xf32>
    %c0_17 = arith.constant 0 : index
    %c16_18 = arith.constant 16 : index
    %c0_19 = arith.constant 0 : index
    %17 = vector.load %arg2[%c0_17, %c16_18, %c0_19] : memref<2x24x128xf32, #tpu.memory_space<vmem>>, vector<2x8x128xf32>
    tpu.vector_store %arg2[%c0_17, %c16_18, %c0_19], %16 {strides = array<i32>} : memref<2x24x128xf32, #tpu.memory_space<vmem>>, vector<2x8x128xf32>,
    return
  }
  func.func @transform_0(%arg0: i32) -> (i32, i32, i32) {
    %c0_i32 = arith.constant 0 : i32
    %c0_i32_0 = arith.constant 0 : i32
    %c0_i32_1 = arith.constant 0 : i32
    return %arg0, %c0_i32, %c0_i32_0 : i32, i32, i32
  }
  func.func @transform_1(%arg0: i32) -> (i32, i32, i32) {
    %c0_i32 = arith.constant 0 : i32
    %c0_i32_0 = arith.constant 0 : i32
    %c0_i32_1 = arith.constant 0 : i32
    return %arg0, %c0_i32, %c0_i32_0 : i32, i32, i32
  }
}

</mosaic_0001>

<bundles_post_ra>
// kernel: tpu_custom_call.1
= control target key start
LH: loop header
LB: loop body
LE: loop exit
PB: predicated region body
PF: predicated region fallthrough
CT: control target
= control target key end

     0   :  { %6 = vsyncpa [#allocation3], 0  ;;  %s160_s0 = inlined_call_operand.hbm [shape: f32[2,24,128], index: 0, kind: input, shape index: {}]   ;;  %s161_s1 = inlined_call_operand.hbm [shape: f32[2,24,128], index: 1, kind: output, shape index: {}]  }
   0x1   :  { %7 = vsyncpa [#allocation4], 0  ;;  %s116_s6 = smov [#allocation2]   ;;  %s68_s10 = scalar_lea.hbm %s160_s0, 768 }
   0x2   :  { %s13_s7 = sshll.u32 %s116_s6, 4  ;;  %p69_p0 = scmp.ne.s32.totalorder %s160_s0, %s68_s10  ;;  %s14_s7 = int_to_ptr.vmem [resolvable:$true] %s13_s7 }
   0x3   :  { %p72_p1 = scmp.lt.u32.totalorder %s68_s10, %s160_s0 }
   0x5   :  { %p74_p2 = pnand %p72_p1, %p69_p0 }
   0x7   :  { %77 = shalt.err (!%p74_p2)
}
   0x8   :  { %s78_s15 = scalar_lea.vmem %s14_s7, 768  ;;  %p83_p4 = scmp.lt.s32.totalorder %s14_s7, %s14_s7 }
   0x9   :  { %p79_p3 = scmp.ne.s32.totalorder %s14_s7, %s78_s15  ;;  %p84_p5 = scmp.lt.s32.totalorder %s78_s15, %s78_s15 }
   0xb   :  { %p85_p6 = por %p84_p5, %p83_p4 }
   0xd   :  { %p86_p7 = pnand %p85_p6, %p79_p3 }
   0xf   :  { %89 = shalt.err (!%p86_p7)
}
  0x10   :  { %s117_s16 = smov 128   ;;  %s118_s17 = smov 8  }
  0x11   :  { %19 = dma.hbm_to_vmem [thread:$0]  %s160_s0, 768, %s14_s7, [#allocation3], %s117_s16, %s117_s16, %s118_s17  }
  0x12   :  { %112 = dma.done.wait [#allocation3], 768  }
  0x13   :  { %113 = vsyncadd [#allocation3], 4294966528  ;;  %v23_v0 = vld [vmem:[#allocation2] sm:$0xff]  ;;  %v24_v1 = vld [vmem:[#allocation2 + $0x18] sm:$0xff]  ;;  %s119_s20 = smov [#allocation5]  }
  0x14   :  { %v31_v2 = vld [vmem:[#allocation2 + $0x8] sm:$0xff]  ;;  %v25_v3 = vmul.f32 4.0469446, %v23_v0  ;;  %v26_v4 = vmul.f32 4.0469446, %v24_v1  ;;  %v32_v6 = vld [vmem:[#allocation2 + $0x20] sm:$0xff] }
  0x15   :  { %v33_v5 = vmul.f32 4.106776, %v31_v2  ;;  %v39_v7 = vld [vmem:[#allocation2 + $0x10] sm:$0xff]  ;;  %v40_v8 = vld [vmem:[#allocation2 + $0x28] sm:$0xff]  ;;  %s52_s21 = sshll.u32 %s119_s20, 4  ;;  %s53_s21 = int_to_ptr.vmem [resolvable:$true] %s52_s21 }
  0x16   :  { %v27_v9 = vadd.f32 -1.9886686, %v25_v3  ;;  %v28_v10 = vadd.f32 -1.9886686, %v26_v4  ;;  %v34_v12 = vmul.f32 4.106776, %v32_v6  ;;  %p95_p9 = scmp.lt.s32.totalorder %s53_s21, %s53_s21 }
  0x17   :  { %v35_v11 = vadd.f32 -1.9802876, %v33_v5  ;;  %v41_v13 = vmul.f32 3.8226302, %v39_v7  ;;  %v42_v14 = vmul.f32 3.8226302, %v40_v8 }
  0x18   :  { %29 = vst [vmem:[#allocation5] sm:$0xff] %v27_v9  ;;  %30 = vst [vmem:[#allocation5 + $0x18] sm:$0xff] %v28_v10  ;;  %v36_v15 = vadd.f32 -1.9802876, %v34_v12  ;;  %s90_s0 = scalar_lea.vmem %s53_s21, 768 }
  0x19   :  { %37 = vst [vmem:[#allocation5 + $0x8] sm:$0xff] %v35_v11  ;;  %v43_v16 = vadd.f32 -1.7068044, %v41_v13  ;;  %v44_v17 = vadd.f32 -1.7068044, %v42_v14  ;;  %p91_p8 = scmp.ne.s32.totalorder %s53_s21, %s90_s0  ;;  %p96_p10 = scmp.lt.s32.totalorder %s90_s0, %s90_s0 }
  0x1a   :  { %38 = vst [vmem:[#allocation5 + $0x20] sm:$0xff] %v36_v15 }
  0x1b   :  { %45 = vst [vmem:[#allocation5 + $0x10] sm:$0xff] %v43_v16  ;;  %46 = vst [vmem:[#allocation5 + $0x28] sm:$0xff] %v44_v17  ;;  %p97_p11 = por %p96_p10, %p95_p9 }
  0x1d   :  { %p98_p12 = pnand %p97_p11, %p91_p8 }
  0x1f   :  { %101 = shalt.err (!%p98_p12)
}
  0x20   :  { %s102_s24 = scalar_lea.hbm %s161_s1, 768 }
  0x21   :  { %p103_p13 = scmp.ne.s32.totalorder %s161_s1, %s102_s24  ;;  %p106_p0 = scmp.lt.u32.totalorder %s102_s24, %s161_s1 }
  0x23   :  { %p108_p1 = pnand %p106_p0, %p103_p13 }
  0x25   :  { %111 = shalt.err (!%p108_p1)
}
  0x26   :  { %58 = dma.vmem_to_hbm [thread:$0]  %s53_s21, 768, %s161_s1, [#allocation4], %s117_s16, %s117_s16, %s118_s17  }
  0x27   :  { %114 = dma.done.wait [#allocation4], 768  }
  0x28   :  { %115 = vsyncadd [#allocation4], 4294966528 }
  0x29   :  { %62 = vsyncpa [#allocation3], 1 }
  0x2a   :  { %63 = vsyncpa [#allocation4], 1 }

</bundles_post_ra>
